<compile_context>
chip_gen: v7x
topology: tpu7x:2x2x1
jax: 0.10.0
libtpu: 0.0.40
codegen_flags: <defaults>
</compile_context>

<pallas_src>
import functools

import jax
import jax.numpy as jnp
from jax.experimental import pallas as pl
from jax.experimental.pallas import tpu as pltpu


def _triplet_loss_kernel(a_ref, p_ref, n_ref, o_ref, *,
                         margin, batch, tile_b, inner_steps):
    c = pl.program_id(0)   # "parallel" axis (split across TensorCores on v7x)
    i = pl.program_id(1)   # "arbitrary" reduction axis over batch tiles

    @pl.when(i == 0)
    def _init():
        o_ref[...] = jnp.zeros_like(o_ref)

    a = a_ref[...].astype(jnp.float32)
    p = p_ref[...].astype(jnp.float32)
    n = n_ref[...].astype(jnp.float32)

    # Fused reduction: distance_positive - distance_negative
    #   = sum((a-p)^2 - (a-n)^2, axis=1)                       -> (TB, 1)
    dpos = a - p
    dneg = a - n
    delta = jnp.sum(dpos * dpos - dneg * dneg, axis=1, keepdims=True)

    # losses = relu(dp - dn + margin)
    losses = jnp.maximum(delta + jnp.float32(margin), jnp.float32(0.0))

    # Mask rows outside the real batch (partial last tile and the clamped,
    # over-provisioned step on the second core).  jnp.where discards any
    # garbage/NaN produced from padded rows.
    rb = c * inner_steps + i          # unclamped logical block id
    row_ids = rb * tile_b + jax.lax.broadcasted_iota(jnp.int32, (tile_b, 1), 0)
    losses = jnp.where(row_ids < batch, losses, jnp.float32(0.0))

    # Scalar partial sum accumulated into the resident (1,1) output block.
    o_ref[...] += jnp.sum(losses, axis=0, keepdims=True)


def _round_up(x, m):
    return ((x + m - 1) // m) * m


def _tpu_generation():
    """Return (tensorcores_per_chip, input_buffer_budget_bytes)."""
    kind = ""
    try:
        kind = jax.devices()[0].device_kind.lower()
    except Exception:
        pass
    if "v7" in kind or "tpu7" in kind or "7x" in kind:
        # v7x: 2 TCs/chip, 64 MiB VMEM per TC, 3.2 TB/s HBM -> bigger blocks pay.
        return 2, 24 * 1024 * 1024
    if "v6" in kind:
        # v6e: 1 TC, 32 MiB default scoped VMEM of 128 MiB physical.
        return 1, 24 * 1024 * 1024
    # v5e and anything unrecognised: conservative (16 MiB default scoped VMEM).
    return 1, 12 * 1024 * 1024


def _choose_tile_b(B, D, itemsize, input_budget_bytes):
    """Largest batch tile s.t. 3 inputs x 2 pipeline buffers of lane-padded
    (tile_b, round_up(D,128)) blocks fit the per-generation byte budget."""
    d_pad = _round_up(D, 128)
    per_row_bytes = d_pad * itemsize
    max_tb = input_budget_bytes // (3 * 2 * per_row_bytes)
    max_tb = max(16, (max_tb // 16) * 16)   # multiple of 16: legal for f32 & bf16
    if B <= max_tb:
        return B                            # full-extent block is always legal
    return max_tb


def triplet_loss(anchor, positive, negative, margin, size_average=True,
                 tile_b=None):
    """Pallas TPU implementation of TripletLoss.forward.

    anchor/positive/negative: (B, D) float arrays (f32 or bf16; bf16 halves HBM
    traffic and is accumulated in f32 inside the kernel).  Returns a scalar f32.
    """
    assert anchor.shape == positive.shape == negative.shape
    assert anchor.ndim == 2
    B, D = anchor.shape
    itemsize = jnp.dtype(anchor.dtype).itemsize

    num_tc, input_budget = _tpu_generation()

    if tile_b is None:
        tile_b = _choose_tile_b(B, D, itemsize, input_budget)
    tile_b = min(tile_b, B)

    num_blocks = pl.cdiv(B, tile_b)                       # real batch tiles
    num_cores = num_tc if num_blocks >= num_tc else 1     # 2 only on v7x
    inner_steps = pl.cdiv(num_blocks, num_cores)

    kernel = functools.partial(
        _triplet_loss_kernel,
        margin=float(margin),
        batch=B,
        tile_b=tile_b,
        inner_steps=inner_steps,
    )

    def in_index(c, i):
        rb = c * inner_steps + i
        # Clamp the (at most one) over-provisioned step on the last core to that
        # core's previous block; identical consecutive block indices elide the
        # DMA and the in-kernel row mask zeroes its contribution.
        return (jnp.minimum(rb, num_blocks - 1), 0)

    in_spec = pl.BlockSpec((tile_b, D), in_index)

    # Explicit VMEM budget derived from the lane-padded block arithmetic:
    # 3 inputs x 2 pipeline buffers + tiny (8,128)-padded output + headroom.
    d_pad = _round_up(D, 128)
    input_bytes = 3 * 2 * tile_b * d_pad * itemsize
    out_bytes = 2 * 8 * 128 * 4
    vmem_limit = max(input_bytes + out_bytes + 2 * 1024 * 1024, 16 * 1024 * 1024)

    partials = pl.pallas_call(
        kernel,
        out_shape=jax.ShapeDtypeStruct((num_cores, 1), jnp.float32),
        grid=(num_cores, inner_steps),
        in_specs=[in_spec, in_spec, in_spec],
        out_specs=pl.BlockSpec((1, 1), lambda c, i: (c, 0)),
        compiler_params=pltpu.CompilerParams(
            dimension_semantics=("parallel", "arbitrary"),
            vmem_limit_bytes=int(vmem_limit)),
    )(anchor, positive, negative)

    total = jnp.sum(partials)
    if size_average:
        return total / jnp.float32(B)   # losses.mean()
    return total                         # losses.sum()


def triplet_loss_ref(anchor, positive, negative, margin, size_average=True):
    """Pure-JAX reference mirroring the PyTorch module."""
    a = anchor.astype(jnp.float32)
    p = positive.astype(jnp.float32)
    n = negative.astype(jnp.float32)
    dp = jnp.sum((a - p) ** 2, axis=1)
    dn = jnp.sum((a - n) ** 2, axis=1)
    losses = jax.nn.relu(dp - dn + margin)
    return jnp.mean(losses) if size_average else jnp.sum(losses)


if __name__ == "__main__":
    margin = 1.0
    key = jax.random.PRNGKey(0)

    # --- primary small test (batch=8, hidden=32), f32 -----------------------
    B, D = 8, 32
    ka, kp, kn = jax.random.split(key, 3)
    anchor = jax.random.normal(ka, (B, D), dtype=jnp.float32)
    positive = jax.random.normal(kp, (B, D), dtype=jnp.float32)
    negative = jax.random.normal(kn, (B, D), dtype=jnp.float32)

    out = jax.block_until_ready(
        triplet_loss(anchor, positive, negative, margin, size_average=True))
    ref = triplet_loss_ref(anchor, positive, negative, margin, size_average=True)
    assert jnp.allclose(out, ref, rtol=1e-5, atol=1e-5), (out, ref)

    out_sum = jax.block_until_ready(
        triplet_loss(anchor, positive, negative, margin, size_average=False))
    ref_sum = triplet_loss_ref(anchor, positive, negative, margin, size_average=False)
    assert jnp.allclose(out_sum, ref_sum, rtol=1e-5, atol=1e-5), (out_sum, ref_sum)

    # --- multi-tile path: B not a multiple of the tile, edge masking --------
    B2, D2, TB2 = 300, 128, 128
    kb = jax.random.split(key, 7)
    a2 = jax.random.normal(kb[1], (B2, D2), dtype=jnp.float32)
    p2 = jax.random.normal(kb[2], (B2, D2), dtype=jnp.float32)
    n2 = jax.random.normal(kb[3], (B2, D2), dtype=jnp.float32)
    out2 = jax.block_until_ready(
        triplet_loss(a2, p2, n2, margin, size_average=True, tile_b=TB2))
    ref2 = triplet_loss_ref(a2, p2, n2, margin, size_average=True)
    assert jnp.allclose(out2, ref2, rtol=1e-4, atol=1e-5), (out2, ref2)

    # --- bf16 inputs (halved HBM traffic), f32 accumulation inside ----------
    a3 = jax.random.normal(kb[4], (64, 128), dtype=jnp.bfloat16)
    p3 = jax.random.normal(kb[5], (64, 128), dtype=jnp.bfloat16)
    n3 = jax.random.normal(kb[6], (64, 128), dtype=jnp.bfloat16)
    out3 = jax.block_until_ready(
        triplet_loss(a3, p3, n3, margin, size_average=True, tile_b=16))
    ref3 = triplet_loss_ref(a3, p3, n3, margin, size_average=True)
    assert jnp.allclose(out3, ref3, rtol=1e-4, atol=1e-4), (out3, ref3)

    # --- auto-tiled path at a slightly larger shape (exercises byte sizing) -
    a4 = jax.random.normal(kb[1], (257, 96), dtype=jnp.float32)
    p4 = jax.random.normal(kb[2], (257, 96), dtype=jnp.float32)
    n4 = jax.random.normal(kb[3], (257, 96), dtype=jnp.float32)
    out4 = jax.block_until_ready(
        triplet_loss(a4, p4, n4, margin, size_average=False))
    ref4 = triplet_loss_ref(a4, p4, n4, margin, size_average=False)
    assert jnp.allclose(out4, ref4, rtol=1e-4, atol=1e-4), (out4, ref4)

    print("KERNEL_OK")
</pallas_src>

<mosaic_0001>
module attributes {stable_mosaic.version = 11 : i64} {
  func.func @_triplet_loss_kernel(%arg0: i32, %arg1: i32, %arg2: memref<8x32xf32, #tpu.memory_space<vmem>>, %arg3: memref<8x32xf32, #tpu.memory_space<vmem>>, %arg4: memref<8x32xf32, #tpu.memory_space<vmem>>, %arg5: memref<1x1xf32, #tpu.memory_space<vmem>>) attributes {dimension_semantics = [#tpu.dimension_semantics<parallel>, #tpu.dimension_semantics<arbitrary>], iteration_bounds = array<i64: 1, 1>, scalar_prefetch = 0 : i64, scratch_operands = 0 : i64, tpu.core_type = #tpu.core_type<tc>, window_params = [{transform_indices = @transform_0, window_bounds = array<i64: 8, 32>}, {transform_indices = @transform_1, window_bounds = array<i64: 8, 32>}, {transform_indices = @transform_2, window_bounds = array<i64: 8, 32>}, {transform_indices = @transform_3, window_bounds = array<i64: 1, 1>}]} {
    %c0_i32 = arith.constant 0 : i32
    %0 = arith.cmpi eq, %arg1, %c0_i32 : i32
    %1 = arith.extui %0 : i1 to i32
    %c0_i32_0 = arith.constant 0 : i32
    %2 = arith.cmpi ne, %1, %c0_i32_0 : i32
    scf.if %2 {
      %cst_15 = arith.constant 0.000000e+00 : f32
      %32 = vector.broadcast %cst_15 : f32 to vector<1x1xf32>
      %c0_16 = arith.constant 0 : index
      %c0_17 = arith.constant 0 : index
      %33 = vector.load %arg5[%c0_16, %c0_17] : memref<1x1xf32, #tpu.memory_space<vmem>>, vector<1x1xf32>
      tpu.vector_store %arg5[%c0_16, %c0_17], %32 {strides = array<i32>} : memref<1x1xf32, #tpu.memory_space<vmem>>, vector<1x1xf32>,
    } else {
    }
    %c0 = arith.constant 0 : index
    %c0_1 = arith.constant 0 : index
    %3 = vector.load %arg2[%c0, %c0_1] : memref<8x32xf32, #tpu.memory_space<vmem>>, vector<8x32xf32>
    %c0_2 = arith.constant 0 : index
    %c0_3 = arith.constant 0 : index
    %4 = vector.load %arg3[%c0_2, %c0_3] : memref<8x32xf32, #tpu.memory_space<vmem>>, vector<8x32xf32>
    %c0_4 = arith.constant 0 : index
    %c0_5 = arith.constant 0 : index
    %5 = vector.load %arg4[%c0_4, %c0_5] : memref<8x32xf32, #tpu.memory_space<vmem>>, vector<8x32xf32>
    %6 = arith.subf %3, %4 : vector<8x32xf32>
    %7 = arith.subf %3, %5 : vector<8x32xf32>
    %8 = arith.mulf %6, %6 : vector<8x32xf32>
    %9 = arith.mulf %7, %7 : vector<8x32xf32>
    %10 = arith.subf %8, %9 : vector<8x32xf32>
    %cst = arith.constant dense<0.000000e+00> : vector<8xf32>
    %11 = vector.multi_reduction <add>, %10, %cst [1] : vector<8x32xf32> to vector<8xf32>
    %12 = vector.shape_cast %11 : vector<8xf32> to vector<8x1xf32>
    %cst_6 = arith.constant 1.000000e+00 : f32
    %13 = vector.broadcast %cst_6 : f32 to vector<8x1xf32>
    %14 = arith.addf %12, %13 : vector<8x1xf32>
    %cst_7 = arith.constant 0.000000e+00 : f32
    %15 = vector.broadcast %cst_7 : f32 to vector<8x1xf32>
    %16 = arith.maximumf %14, %15 : vector<8x1xf32>
    %c1_i32 = arith.constant 1 : i32
    %17 = arith.muli %arg0, %c1_i32 : i32
    %18 = arith.addi %17, %arg1 : i32
    %c8_i32 = arith.constant 8 : i32
    %19 = arith.muli %18, %c8_i32 : i32
    %20 = tpu.iota {dimensions = array<i32: 0>} : vector<8x1xi32>
    %21 = vector.broadcast %19 : i32 to vector<8x1xi32>
    %22 = arith.addi %21, %20 : vector<8x1xi32>
    %c8_i32_8 = arith.constant 8 : i32
    %23 = vector.broadcast %c8_i32_8 : i32 to vector<8x1xi32>
    %24 = arith.cmpi slt, %22, %23 : vector<8x1xi32>
    %cst_9 = arith.constant 0.000000e+00 : f32
    %25 = vector.broadcast %cst_9 : f32 to vector<8x1xf32>
    %26 = arith.select %24, %16, %25 : vector<8x1xi1>, vector<8x1xf32>
    %c0_10 = arith.constant 0 : index
    %c0_11 = arith.constant 0 : index
    %27 = vector.load %arg5[%c0_10, %c0_11] : memref<1x1xf32, #tpu.memory_space<vmem>>, vector<1x1xf32>
    %cst_12 = arith.constant dense<0.000000e+00> : vector<1xf32>
    %28 = vector.multi_reduction <add>, %26, %cst_12 [0] : vector<8x1xf32> to vector<1xf32>
    %29 = vector.shape_cast %28 : vector<1xf32> to vector<1x1xf32>
    %30 = arith.addf %27, %29 : vector<1x1xf32>
    %c0_13 = arith.constant 0 : index
    %c0_14 = arith.constant 0 : index
    %31 = vector.load %arg5[%c0_13, %c0_14] : memref<1x1xf32, #tpu.memory_space<vmem>>, vector<1x1xf32>
    tpu.vector_store %arg5[%c0_13, %c0_14], %30 {strides = array<i32>} : memref<1x1xf32, #tpu.memory_space<vmem>>, vector<1x1xf32>,
    return
  }
  func.func @transform_0(%arg0: i32, %arg1: i32) -> (i32, i32) {
    %c1_i32 = arith.constant 1 : i32
    %0 = arith.muli %arg0, %c1_i32 : i32
    %1 = arith.addi %0, %arg1 : i32
    %c0_i32 = arith.constant 0 : i32
    %2 = arith.minsi %1, %c0_i32 : i32
    %c0_i32_0 = arith.constant 0 : i32
    %c0_i32_1 = arith.constant 0 : i32
    return %2, %c0_i32_0 : i32, i32
  }
  func.func @transform_1(%arg0: i32, %arg1: i32) -> (i32, i32) {
    %c1_i32 = arith.constant 1 : i32
    %0 = arith.muli %arg0, %c1_i32 : i32
    %1 = arith.addi %0, %arg1 : i32
    %c0_i32 = arith.constant 0 : i32
    %2 = arith.minsi %1, %c0_i32 : i32
    %c0_i32_0 = arith.constant 0 : i32
    %c0_i32_1 = arith.constant 0 : i32
    return %2, %c0_i32_0 : i32, i32
  }
  func.func @transform_2(%arg0: i32, %arg1: i32) -> (i32, i32) {
    %c1_i32 = arith.constant 1 : i32
    %0 = arith.muli %arg0, %c1_i32 : i32
    %1 = arith.addi %0, %arg1 : i32
    %c0_i32 = arith.constant 0 : i32
    %2 = arith.minsi %1, %c0_i32 : i32
    %c0_i32_0 = arith.constant 0 : i32
    %c0_i32_1 = arith.constant 0 : i32
    return %2, %c0_i32_0 : i32, i32
  }
  func.func @transform_3(%arg0: i32, %arg1: i32) -> (i32, i32) {
    %c0_i32 = arith.constant 0 : i32
    %c0_i32_0 = arith.constant 0 : i32
    return %arg0, %c0_i32 : i32, i32
  }
}

</mosaic_0001>

<bundles_post_ra>
// kernel: tpu_custom_call.1
= control target key start
LH: loop header
LB: loop body
LE: loop exit
PB: predicated region body
PF: predicated region fallthrough
CT: control target
= control target key end

     0   :  { %8 = vsyncpa [#allocation3], 0  ;;  %s308_s0 = inlined_call_operand.hbm [shape: f32[8,32], index: 0, kind: input, shape index: {}]   ;;  %s309_s1 = inlined_call_operand.hbm [shape: f32[8,32], index: 1, kind: input, shape index: {}]   ;;  %s310_s2 = inlined_call_operand.hbm [shape: f32[8,32], index: 2, kind: input, shape index: {}]   ;;  %s311_s3 = inlined_call_operand.hbm [shape: f32[1,1], index: 3, kind: output, shape index: {}]  }
   0x1   :  { %9 = vsyncpa [#allocation6], 0 }
   0x2   :  { %10 = vsyncpa [#allocation4], 0  ;;  %s233_s12 = smov [#allocation5]   ;;  %s234_s14 = smov [#allocation2]  }
   0x3   :  { %s37_s13 = sshll.u32 %s233_s12, 4  ;;  %s22_s15 = sshll.u32 %s234_s14, 4  ;;  %s38_s13 = int_to_ptr.vmem [resolvable:$true] %s37_s13  ;;  %s23_s15 = int_to_ptr.vmem [resolvable:$true] %s22_s15 }
   0x4   :  { %s139_s18 = scalar_lea.hbm %s309_s1, 128 }
   0x5   :  { %p140_p0 = scmp.ne.s32.totalorder %s309_s1, %s139_s18  ;;  %p143_p1 = scmp.lt.u32.totalorder %s139_s18, %s309_s1 }
   0x7   :  { %p145_p2 = pnand %p143_p1, %p140_p0 }
   0x9   :  { %148 = shalt.err (!%p145_p2)
}
   0xa   :  { %s149_s23 = scalar_lea.vmem %s38_s13, 128  ;;  %p154_p4 = scmp.lt.s32.totalorder %s38_s13, %s38_s13 }
   0xb   :  { %p150_p3 = scmp.ne.s32.totalorder %s38_s13, %s149_s23  ;;  %p155_p5 = scmp.lt.s32.totalorder %s149_s23, %s149_s23 }
   0xd   :  { %p156_p6 = por %p155_p5, %p154_p4 }
   0xf   :  { %p157_p7 = pnand %p156_p6, %p150_p3 }
  0x11   :  { %160 = shalt.err (!%p157_p7)
}
  0x12   :  { %40 = dma.hbm_to_vmem [thread:$0]  %s309_s1, 128, %s38_s13, [#allocation6]  }
  0x13   :  { %s161_s28 = scalar_lea.hbm %s308_s0, 128 }
  0x14   :  { %p162_p8 = scmp.ne.s32.totalorder %s308_s0, %s161_s28  ;;  %p165_p9 = scmp.lt.u32.totalorder %s161_s28, %s308_s0 }
  0x16   :  { %p167_p10 = pnand %p165_p9, %p162_p8 }
  0x18   :  { %170 = shalt.err (!%p167_p10)
}
  0x19   :  { %s171_s6 = scalar_lea.vmem %s23_s15, 128  ;;  %p176_p12 = scmp.lt.s32.totalorder %s23_s15, %s23_s15 }
  0x1a   :  { %p172_p11 = scmp.ne.s32.totalorder %s23_s15, %s171_s6  ;;  %p177_p13 = scmp.lt.s32.totalorder %s171_s6, %s171_s6 }
  0x1c   :  { %p178_p0 = por %p177_p13, %p176_p12 }
  0x1e   :  { %p179_p1 = pnand %p178_p0, %p172_p11 }
  0x20   :  { %182 = shalt.err (!%p179_p1)
}
  0x21   :  { %25 = dma.hbm_to_vmem [thread:$0]  %s308_s0, 128, %s23_s15, [#allocation3]  }
  0x22   :  { %s235_s8 = smov [#allocation7]   ;;  %s183_s12 = scalar_lea.hbm %s310_s2, 128 }
  0x23   :  { %s52_s9 = sshll.u32 %s235_s8, 4  ;;  %p184_p2 = scmp.ne.s32.totalorder %s310_s2, %s183_s12  ;;  %s53_s9 = int_to_ptr.vmem [resolvable:$true] %s52_s9 }
  0x24   :  { %p187_p3 = scmp.lt.u32.totalorder %s183_s12, %s310_s2 }
  0x26   :  { %p189_p4 = pnand %p187_p3, %p184_p2 }
  0x28   :  { %192 = shalt.err (!%p189_p4)
}
  0x29   :  { %s193_s18 = scalar_lea.vmem %s53_s9, 128  ;;  %p198_p6 = scmp.lt.s32.totalorder %s53_s9, %s53_s9 }
  0x2a   :  { %p194_p5 = scmp.ne.s32.totalorder %s53_s9, %s193_s18  ;;  %p199_p7 = scmp.lt.s32.totalorder %s193_s18, %s193_s18 }
  0x2c   :  { %p200_p8 = por %p199_p7, %p198_p6 }
  0x2e   :  { %p201_p9 = pnand %p200_p8, %p194_p5 }
  0x30   :  { %204 = shalt.err (!%p201_p9)
}
  0x31   :  { %55 = dma.hbm_to_vmem [thread:$0]  %s310_s2, 128, %s53_s9, [#allocation6]  }
  0x32   :  { %227 = dma.done.wait [#allocation3], 128  }
  0x33   :  { %228 = vsyncadd [#allocation3], 4294967168 }
  0x34   :  { %229 = dma.done.wait [#allocation6], 256  }
  0x35   :  { %230 = vsyncadd [#allocation6], 4294967040  ;;  %v80_v0 = vld [vmem:[#allocation2] sm:$0xff]  ;;  %v81_v1 = vld [vmem:[#allocation5] sm:$0xff]  ;;  %vm88_vm0 = vcmask 261120   ;;  %vm78_vm1 = vcmask 0  }
  0x36   :  { %v82_v2 = vld [vmem:[#allocation7] sm:$0xff]  ;;  %v83_v3 = vsub.f32 %v80_v0, %v81_v1  ;;  %v236_v9 = vmov 0.0   ;;  %s237_s2 = smov [#allocation8]  }
  0x37   :  { %v84_v4 = vsub.f32 %v80_v0, %v82_v2  ;;  %79 = vst.msk [vmem:[#allocation8] sm:$0x1] %vm78_vm1, %v236_v9  ;;  %s118_s19 = sshll.u32 %s237_s2, 4  ;;  %s119_s19 = int_to_ptr.vmem [resolvable:$true] %s118_s19 }
  0x38   :  { %v85_v5 = vmul.f32 %v83_v3, %v83_v3  ;;  %s205_s20 = scalar_lea.vmem %s119_s19, 16  ;;  %s209_s21 = scalar_lea.vmem %s119_s19, 32 }
  0x39   :  { %v86_v6 = vmul.f32 %v84_v4, %v84_v4  ;;  %p206_p10 = scmp.ne.s32.totalorder %s119_s19, %s205_s20  ;;  %p210_p11 = scmp.lt.s32.totalorder %s119_s19, %s119_s19 }
  0x3a   :  { %p211_p12 = scmp.lt.s32.totalorder %s209_s21, %s205_s20 }
  0x3b   :  { %v87_v7 = vsub.f32 %v85_v5, %v86_v6 }
  0x3c   :  { %p212_p13 = por %p211_p12, %p210_p11 }
  0x3d   :  { %v89_v8 = vsel %vm88_vm0, %v87_v7, 0.0 }
  0x3e   :  { %90 = vadd.xlane.f32.xlu0 %v89_v8  ;;  %v102_v18 = vld [vmem:[#allocation8] sm:$0x1]  ;;  %p213_p0 = pnand %p212_p13, %p206_p10 }
  0xcb   :  { %v91_v10 = vpop.xlane.xlu0 %90 }
  0xcc   :  { %v92_v11 = vadd.f32 1.0, %v91_v10 }
  0xce   :  { %v93_v12 = vmax.f32 %v92_v11, 0.0 }
  0xd0   :  { %v103_v13 = vrot.slane %v93_v12, 4 }
  0xd2   :  { %v104_v14 = vadd.f32 %v103_v13, %v93_v12 }
  0xd4   :  { %v105_v15 = vrot.slane %v104_v14, 2 }
  0xd6   :  { %v106_v16 = vadd.f32 %v105_v15, %v104_v14 }
  0xd8   :  { %v107_v17 = vrot.slane %v106_v16, 1 }
  0xda   :  { %v108_v19 = vadd.f32 %v107_v17, %v106_v16 }
  0xdc   :  { %v109_v20 = vadd.f32 %v108_v19, %v102_v18 }
  0xde   :  { %111 = vst.msk [vmem:[#allocation8] sm:$0x1] %vm78_vm1, %v109_v20 }
  0xdf   :  { %216 = shalt.err (!%p213_p0)
}
  0xe0   :  { %s217_s24 = scalar_lea.hbm %s311_s3, 16 }
  0xe1   :  { %p218_p1 = scmp.ne.s32.totalorder %s311_s3, %s217_s24  ;;  %p221_p2 = scmp.lt.u32.totalorder %s217_s24, %s311_s3 }
  0xe3   :  { %p223_p3 = pnand %p221_p2, %p218_p1 }
  0xe5   :  { %226 = shalt.err (!%p223_p3)
}
  0xe6   :  { %121 = dma.vmem_to_hbm [thread:$0]  %s119_s19, 16, %s311_s3, [#allocation4]  }
  0xe7   :  { %231 = dma.done.wait [#allocation4], 16  }
  0xe8   :  { %232 = vsyncadd [#allocation4], 4294967280 }
  0xe9   :  { %125 = vsyncpa [#allocation3], 1 }
  0xea   :  { %126 = vsyncpa [#allocation6], 1 }
  0xeb   :  { %127 = vsyncpa [#allocation4], 1 }

</bundles_post_ra>
